<compile_context>
chip_gen: v6e
topology: v6e:2x2x1
jax: 0.10.0
libtpu: 0.0.40
codegen_flags: <defaults>
</compile_context>

<pallas_src>
import math
from functools import partial

import numpy as np
import jax
import jax.numpy as jnp
from jax import lax
from jax.experimental import pallas as pl
from jax.experimental.pallas import tpu as pltpu


# ----------------------------------------------------------------------------
# Tiling helper
# ----------------------------------------------------------------------------

def _pick_tile(dim, target, align):
    """Largest t <= target with t % align == 0 and dim % t == 0; else dim."""
    if dim <= target:
        return dim
    t = (target // align) * align
    while t >= align:
        if dim % t == 0:
            return t
        t -= align
    return dim


# ----------------------------------------------------------------------------
# Tiled matmul + bias (+ activation, + residual) kernel
# ----------------------------------------------------------------------------

def _mm_kernel(x_ref, w_ref, b_ref, *rest, act, nk, has_res):
    if has_res:
        res_ref, o_ref, acc_ref = rest
    else:
        res_ref = None
        o_ref, acc_ref = rest

    k = pl.program_id(2)

    @pl.when(k == 0)
    def _():
        acc_ref[...] = jnp.zeros_like(acc_ref)

    acc_ref[...] += jnp.dot(x_ref[...], w_ref[...],
                            preferred_element_type=jnp.float32)

    @pl.when(k == nk - 1)
    def _():
        y = acc_ref[...] + b_ref[...].astype(jnp.float32)
        if act == "quick_gelu":                       # x * sigmoid(1.702 x)
            y = y * jax.nn.sigmoid(1.702 * y)
        elif act == "gelu":                           # exact erf GELU
            y = 0.5 * y * (1.0 + lax.erf(y * (1.0 / math.sqrt(2.0))))
        if res_ref is not None:
            y = y + res_ref[...].astype(jnp.float32)
        o_ref[...] = y.astype(o_ref.dtype)


def pallas_matmul_bias(x, w, b, act="none", residual=None,
                       out_dtype=jnp.float32, bm=256, bn=256, bk=512):
    M, K = x.shape
    K2, N = w.shape
    assert K == K2
    x = x.astype(jnp.bfloat16)
    w = w.astype(jnp.bfloat16)
    b2 = b.astype(jnp.float32).reshape(1, N)

    tm = _pick_tile(M, bm, 8)
    tn = _pick_tile(N, bn, 128)
    tk = _pick_tile(K, bk, 128)
    nm, nn, nk = M // tm, N // tn, K // tk

    in_specs = [
        pl.BlockSpec((tm, tk), lambda i, j, k: (i, k)),
        pl.BlockSpec((tk, tn), lambda i, j, k: (k, j)),
        pl.BlockSpec((1, tn), lambda i, j, k: (0, j)),
    ]
    args = [x, w, b2]
    if residual is not None:
        in_specs.append(pl.BlockSpec((tm, tn), lambda i, j, k: (i, j)))
        args.append(residual)

    bytes_accessed = (M * K + K * N) * 2 + M * N * np.dtype(out_dtype).itemsize
    if residual is not None:
        bytes_accessed += M * N * np.dtype(residual.dtype).itemsize

    return pl.pallas_call(
        partial(_mm_kernel, act=act, nk=nk, has_res=residual is not None),
        out_shape=jax.ShapeDtypeStruct((M, N), out_dtype),
        grid=(nm, nn, nk),
        in_specs=in_specs,
        out_specs=pl.BlockSpec((tm, tn), lambda i, j, k: (i, j)),
        scratch_shapes=[pltpu.VMEM((tm, tn), jnp.float32)],
        compiler_params=pltpu.CompilerParams(
            dimension_semantics=("parallel", "parallel", "arbitrary"),
            vmem_limit_bytes=32 * 1024 * 1024),
        cost_estimate=pl.CostEstimate(
            flops=2 * M * N * K,
            transcendentals=(M * N if act != "none" else 0),
            bytes_accessed=int(bytes_accessed)),
    )(*args)


# ----------------------------------------------------------------------------
# Row-tiled LayerNorm kernel (fp32 stats, bf16 output for the MXU consumer)
# ----------------------------------------------------------------------------

def _ln_kernel(x_ref, g_ref, b_ref, o_ref, *, eps):
    x = x_ref[...].astype(jnp.float32)
    mean = jnp.mean(x, axis=-1, keepdims=True)
    xc = x - mean
    var = jnp.mean(xc * xc, axis=-1, keepdims=True)
    y = xc * lax.rsqrt(var + eps)
    y = y * g_ref[...].astype(jnp.float32) + b_ref[...].astype(jnp.float32)
    o_ref[...] = y.astype(o_ref.dtype)


def pallas_layernorm(x, g, b, eps=1e-6, out_dtype=jnp.bfloat16, bm=256):
    M, N = x.shape
    tm = _pick_tile(M, bm, 8)
    return pl.pallas_call(
        partial(_ln_kernel, eps=eps),
        out_shape=jax.ShapeDtypeStruct((M, N), out_dtype),
        grid=(M // tm,),
        in_specs=[pl.BlockSpec((tm, N), lambda i: (i, 0)),
                  pl.BlockSpec((1, N), lambda i: (0, 0)),
                  pl.BlockSpec((1, N), lambda i: (0, 0))],
        out_specs=pl.BlockSpec((tm, N), lambda i: (i, 0)),
        compiler_params=pltpu.CompilerParams(
            dimension_semantics=("parallel",)),
    )(x, g.reshape(1, N), b.reshape(1, N))


# ----------------------------------------------------------------------------
# Flash attention with fused RoPE + segment masking from cu_seqlens
# ----------------------------------------------------------------------------

def _flash_attn_kernel(cu_ref, q_ref, k_ref, v_ref,
                       cosq_ref, sinq_ref, cosk_ref, sink_ref,
                       o_ref, m_sc, l_sc, acc_sc, *, scale):
    qi = pl.program_id(1)
    ki = pl.program_id(2)
    tq = q_ref.shape[1]
    tk = k_ref.shape[1]

    @pl.when(ki == 0)
    def _():
        m_sc[...] = jnp.full_like(m_sc, -1e30)
        l_sc[...] = jnp.zeros_like(l_sc)
        acc_sc[...] = jnp.zeros_like(acc_sc)

    def rope(x, c, s):                                # non-interleaved RoPE
        d = x.shape[-1] // 2
        rot = jnp.concatenate([-x[..., d:], x[..., :d]], axis=-1)
        return x * c + rot * s

    q = rope(q_ref[0].astype(jnp.float32), cosq_ref[...], sinq_ref[...]) * scale
    k = rope(k_ref[0].astype(jnp.float32), cosk_ref[...], sink_ref[...])

    # scores (tq, tk), bf16 operands on the MXU, fp32 accumulation
    s = lax.dot_general(q.astype(jnp.bfloat16), k.astype(jnp.bfloat16),
                        (((1,), (1,)), ((), ())),
                        preferred_element_type=jnp.float32)

    # segment mask built in-kernel from scalar-prefetched cu_seqlens
    nseg = cu_ref.shape[0] - 1
    row = qi * tq + lax.broadcasted_iota(jnp.int32, (tq, tk), 0)
    col = ki * tk + lax.broadcasted_iota(jnp.int32, (tq, tk), 1)
    row_seg = jnp.zeros((tq, tk), jnp.int32)
    col_seg = jnp.zeros((tq, tk), jnp.int32)
    for bnd in range(1, nseg):
        c = cu_ref[bnd]
        row_seg = row_seg + (row >= c).astype(jnp.int32)
        col_seg = col_seg + (col >= c).astype(jnp.int32)
    mask = row_seg == col_seg

    s = jnp.where(mask, s, -1e30)

    m_prev = m_sc[...]
    m_new = jnp.maximum(m_prev, jnp.max(s, axis=-1, keepdims=True))
    alpha = jnp.exp(m_prev - m_new)
    p = jnp.exp(s - m_new)
    p = jnp.where(mask, p, 0.0)                       # robust for all-masked tiles
    l_sc[...] = alpha * l_sc[...] + jnp.sum(p, axis=-1, keepdims=True)
    acc_sc[...] = alpha * acc_sc[...] + jnp.dot(
        p.astype(jnp.bfloat16), v_ref[0], preferred_element_type=jnp.float32)
    m_sc[...] = m_new

    @pl.when(ki == pl.num_programs(2) - 1)
    def _():
        inv_l = pl.reciprocal(jnp.maximum(l_sc[...], 1e-30), approx=True)
        o_ref[0] = (acc_sc[...] * inv_l).astype(o_ref.dtype)


def pallas_flash_attention(q, k, v, cos, sin, cu, tq=128, tk=128):
    H, S, D = q.shape
    scale = 1.0 / math.sqrt(D)
    tq = _pick_tile(S, tq, 8)
    tk = _pick_tile(S, tk, 8)
    nq, nk = S // tq, S // tk

    cos = cos.astype(jnp.float32)
    sin = sin.astype(jnp.float32)

    grid_spec = pltpu.PrefetchScalarGridSpec(
        num_scalar_prefetch=1,
        grid=(H, nq, nk),
        in_specs=[
            pl.BlockSpec((1, tq, D), lambda h, qi, ki, cu_s: (h, qi, 0)),   # q
            pl.BlockSpec((1, tk, D), lambda h, qi, ki, cu_s: (h, ki, 0)),   # k
            pl.BlockSpec((1, tk, D), lambda h, qi, ki, cu_s: (h, ki, 0)),   # v
            pl.BlockSpec((tq, D), lambda h, qi, ki, cu_s: (qi, 0)),         # cos(q)
            pl.BlockSpec((tq, D), lambda h, qi, ki, cu_s: (qi, 0)),         # sin(q)
            pl.BlockSpec((tk, D), lambda h, qi, ki, cu_s: (ki, 0)),         # cos(k)
            pl.BlockSpec((tk, D), lambda h, qi, ki, cu_s: (ki, 0)),         # sin(k)
        ],
        out_specs=pl.BlockSpec((1, tq, D), lambda h, qi, ki, cu_s: (h, qi, 0)),
        scratch_shapes=[pltpu.VMEM((tq, 1), jnp.float32),
                        pltpu.VMEM((tq, 1), jnp.float32),
                        pltpu.VMEM((tq, D), jnp.float32)],
    )

    return pl.pallas_call(
        partial(_flash_attn_kernel, scale=scale),
        out_shape=jax.ShapeDtypeStruct((H, S, D), jnp.bfloat16),
        grid_spec=grid_spec,
        compiler_params=pltpu.CompilerParams(
            dimension_semantics=("parallel", "parallel", "arbitrary"),
            vmem_limit_bytes=32 * 1024 * 1024),
        cost_estimate=pl.CostEstimate(
            flops=4 * H * S * S * D,
            transcendentals=H * S * S,
            bytes_accessed=int(4 * H * S * D * 2 + 2 * S * D * 4)),
    )(cu, q.astype(jnp.bfloat16), k.astype(jnp.bfloat16), v.astype(jnp.bfloat16),
      cos, sin, cos, sin)


# ----------------------------------------------------------------------------
# Host-side glue: rotary table + cu_seqlens (cached per grid_thw)
# ----------------------------------------------------------------------------

_POS_CACHE = {}


def _compute_rotary_freqs(grid_thw, head_dim, sms, theta=10000.0):
    pos_ids = []
    for t, h, w in grid_thw:
        hpos = np.repeat(np.arange(h)[:, None], w, axis=1)
        wpos = np.repeat(np.arange(w)[None, :], h, axis=0)
        hpos = hpos.reshape(h // sms, sms, w // sms, sms).transpose(0, 2, 1, 3).reshape(-1)
        wpos = wpos.reshape(h // sms, sms, w // sms, sms).transpose(0, 2, 1, 3).reshape(-1)
        pid = np.stack([hpos, wpos], axis=-1)
        pos_ids.append(np.tile(pid, (t, 1)))
    pos_ids = np.concatenate(pos_ids, axis=0)                      # (L, 2)
    max_grid = int(grid_thw[:, 1:].max())
    dim = head_dim // 2
    inv_freq = 1.0 / theta ** (np.arange(0, dim, 2, dtype=np.float32) / dim)
    seq = np.arange(max_grid, dtype=np.float32)
    freqs_full = np.outer(seq, inv_freq)
    return freqs_full[pos_ids].reshape(pos_ids.shape[0], -1).astype(np.float32)


def rotary_and_cu(grid_thw, head_dim, sms):
    key = (grid_thw.tobytes(), grid_thw.shape, head_dim, sms)
    if key in _POS_CACHE:
        return _POS_CACHE[key]
    freqs = _compute_rotary_freqs(grid_thw, head_dim, sms)          # (L, hd//2)
    cos = np.concatenate([np.cos(freqs), np.cos(freqs)], axis=-1)   # (L, hd)
    sin = np.concatenate([np.sin(freqs), np.sin(freqs)], axis=-1)
    seqlens = np.repeat(grid_thw[:, 1] * grid_thw[:, 2], grid_thw[:, 0])
    cu = np.concatenate([[0], np.cumsum(seqlens)]).astype(np.int32)
    out = (jnp.asarray(cos, jnp.float32), jnp.asarray(sin, jnp.float32),
           jnp.asarray(cu, jnp.int32))
    _POS_CACHE[key] = out
    return out


# ----------------------------------------------------------------------------
# Parameters (weights bf16 for the MXU, biases / LN params fp32)
# ----------------------------------------------------------------------------

def init_params(key, cfg):
    E = cfg["embed_dim"]
    D = cfg["hidden_size"]
    MLP = int(E * cfg["mlp_ratio"])
    MH = E * cfg["spatial_merge_size"] ** 2
    K = cfg["in_chans"] * cfg["temporal_patch_size"] * cfg["patch_size"] ** 2

    def w_init(k, shape, scale=0.02):
        return (jax.random.normal(k, shape, jnp.float32) * scale).astype(jnp.bfloat16)

    def b_init(k, shape, scale=0.02):
        return jax.random.normal(k, shape, jnp.float32) * scale

    keys = iter(jax.random.split(key, 8 * cfg["depth"] + 8))
    p = {"patch_w": w_init(next(keys), (K, E))}
    p["blocks"] = []
    for _ in range(cfg["depth"]):
        p["blocks"].append(dict(
            ln1_g=jnp.ones((E,), jnp.float32), ln1_b=jnp.zeros((E,), jnp.float32),
            qkv_w=w_init(next(keys), (E, 3 * E)), qkv_b=b_init(next(keys), (3 * E,)),
            proj_w=w_init(next(keys), (E, E)), proj_b=b_init(next(keys), (E,)),
            ln2_g=jnp.ones((E,), jnp.float32), ln2_b=jnp.zeros((E,), jnp.float32),
            fc1_w=w_init(next(keys), (E, MLP)), fc1_b=b_init(next(keys), (MLP,)),
            fc2_w=w_init(next(keys), (MLP, E)), fc2_b=b_init(next(keys), (E,)),
        ))
    p["merger"] = dict(
        lnq_g=jnp.ones((E,), jnp.float32), lnq_b=jnp.zeros((E,), jnp.float32),
        fc1_w=w_init(next(keys), (MH, MH)), fc1_b=b_init(next(keys), (MH,)),
        fc2_w=w_init(next(keys), (MH, D)), fc2_b=b_init(next(keys), (D,)),
    )
    return p


# ----------------------------------------------------------------------------
# Forward pass
# ----------------------------------------------------------------------------

def qwen2_vision_forward(x, grid_thw, params, cfg, tiles=None):
    tiles = tiles or {}
    bm = tiles.get("bm", 256)
    bn = tiles.get("bn", 256)
    bk = tiles.get("bk", 512)
    tq = tiles.get("tq", 128)
    tkv = tiles.get("tk", 128)

    E = cfg["embed_dim"]
    H = cfg["num_heads"]
    hd = E // H
    sms = cfg["spatial_merge_size"]
    L = x.shape[0]

    cos, sin, cu = rotary_and_cu(np.asarray(grid_thw), hd, sms)

    # --- patch embed: Conv3d(kernel==stride, bias=False) == matmul ---
    zero_e = jnp.zeros((E,), jnp.float32)
    h = pallas_matmul_bias(x, params["patch_w"], zero_e,
                           out_dtype=jnp.float32, bm=bm, bn=bn, bk=bk)   # (L, E) f32

    for bp in params["blocks"]:
        # attention sub-block
        hn = pallas_layernorm(h, bp["ln1_g"], bp["ln1_b"], bm=bm)        # bf16
        qkv = pallas_matmul_bias(hn, bp["qkv_w"], bp["qkv_b"],
                                 out_dtype=jnp.bfloat16, bm=bm, bn=bn, bk=bk)
        # TODO(synk): the head split/transpose below stays in XLA; fusing it into
        # the attention kernel would need sub-128 lane blocking on the 3E axis.
        qkv = jnp.transpose(qkv.reshape(L, H, 3, hd), (2, 1, 0, 3))      # (3,H,L,hd)
        q, k, v = qkv[0], qkv[1], qkv[2]
        attn = pallas_flash_attention(q, k, v, cos, sin, cu, tq=tq, tk=tkv)
        attn = jnp.transpose(attn, (1, 0, 2)).reshape(L, E)              # (L,E) bf16
        h = pallas_matmul_bias(attn, bp["proj_w"], bp["proj_b"], residual=h,
                               out_dtype=jnp.float32, bm=bm, bn=bn, bk=bk)

        # MLP sub-block
        hn = pallas_layernorm(h, bp["ln2_g"], bp["ln2_b"], bm=bm)
        m = pallas_matmul_bias(hn, bp["fc1_w"], bp["fc1_b"], act="quick_gelu",
                               out_dtype=jnp.bfloat16, bm=bm, bn=bn, bk=bk)
        h = pallas_matmul_bias(m, bp["fc2_w"], bp["fc2_b"], residual=h,
                               out_dtype=jnp.float32, bm=bm, bn=bn, bk=bk)

    # --- patch merger ---
    mp = params["merger"]
    hn = pallas_layernorm(h, mp["lnq_g"], mp["lnq_b"], bm=bm)            # (L,E) bf16
    hn = hn.reshape(-1, E * sms * sms)                                   # (L/4, 4E)
    o = pallas_matmul_bias(hn, mp["fc1_w"], mp["fc1_b"], act="gelu",
                           out_dtype=jnp.bfloat16, bm=bm, bn=bn, bk=bk)
    o = pallas_matmul_bias(o, mp["fc2_w"], mp["fc2_b"],
                           out_dtype=jnp.float32, bm=bm, bn=bn, bk=bk)
    return o


# ----------------------------------------------------------------------------
# Main
# ----------------------------------------------------------------------------

if __name__ == "__main__":
    cfg = dict(
        patch_size=2,
        temporal_patch_size=2,
        spatial_merge_size=2,
        in_chans=3,
        hidden_size=64,     # output d_model of the merger
        embed_dim=32,
        depth=2,
        num_heads=2,
        mlp_ratio=4.0,
    )

    # two "images": (t, h, w) grids of patches -> seqlens 16 and 8, L = 24
    grid_thw = np.array([[1, 4, 4], [1, 2, 4]], dtype=np.int64)
    L = int((grid_thw[:, 0] * grid_thw[:, 1] * grid_thw[:, 2]).sum())            # 24
    K = cfg["in_chans"] * cfg["temporal_patch_size"] * cfg["patch_size"] ** 2    # 24

    key = jax.random.PRNGKey(0)
    k_in, k_par = jax.random.split(key)
    x = jax.random.normal(k_in, (L, K), jnp.float32)
    params = init_params(k_par, cfg)

    # small tiles so the toy shapes exercise multi-step grids (row tiling,
    # multiple q/kv tiles and the segment boundary inside the flash kernel)
    tiles = dict(bm=8, bn=256, bk=512, tq=8, tk=8)

    out = qwen2_vision_forward(x, grid_thw, params, cfg, tiles=tiles)
    out = jax.block_until_ready(out)

    expected_shape = (L // cfg["spatial_merge_size"] ** 2, cfg["hidden_size"])
    assert out.shape == expected_shape, (out.shape, expected_shape)
    assert bool(jnp.all(jnp.isfinite(out)))
    print("KERNEL_OK")
</pallas_src>

<mosaic_0001>
module attributes {stable_mosaic.version = 11 : i64} {
  func.func @_mm_kernel(%arg0: i32, %arg1: i32, %arg2: i32, %arg3: memref<8x24xbf16, #tpu.memory_space<vmem>>, %arg4: memref<24x32xbf16, #tpu.memory_space<vmem>>, %arg5: memref<1x32xf32, #tpu.memory_space<vmem>>, %arg6: memref<8x32xf32, #tpu.memory_space<vmem>>, %arg7: memref<8x32xf32, #tpu.memory_space<vmem>>) attributes {dimension_semantics = [#tpu.dimension_semantics<parallel>, #tpu.dimension_semantics<parallel>, #tpu.dimension_semantics<arbitrary>], iteration_bounds = array<i64: 3, 1, 1>, scalar_prefetch = 0 : i64, scratch_operands = 1 : i64, tpu.core_type = #tpu.core_type<tc>, window_params = [{transform_indices = @transform_0, window_bounds = array<i64: 8, 24>}, {transform_indices = @transform_1, window_bounds = array<i64: 24, 32>}, {transform_indices = @transform_2, window_bounds = array<i64: 1, 32>}, {transform_indices = @transform_3, window_bounds = array<i64: 8, 32>}]} {
    %c0_i32 = arith.constant 0 : i32
    %0 = arith.cmpi eq, %arg2, %c0_i32 : i32
    %1 = arith.extui %0 : i1 to i32
    %c0_i32_0 = arith.constant 0 : i32
    %2 = arith.cmpi ne, %1, %c0_i32_0 : i32
    scf.if %2 {
      %cst_10 = arith.constant 0.000000e+00 : f32
      %12 = vector.broadcast %cst_10 : f32 to vector<8x32xf32>
      %c0_11 = arith.constant 0 : index
      %c0_12 = arith.constant 0 : index
      %13 = vector.load %arg7[%c0_11, %c0_12] : memref<8x32xf32, #tpu.memory_space<vmem>>, vector<8x32xf32>
      tpu.vector_store %arg7[%c0_11, %c0_12], %12 {strides = array<i32>} : memref<8x32xf32, #tpu.memory_space<vmem>>, vector<8x32xf32>,
    } else {
    }
    %c0 = arith.constant 0 : index
    %c0_1 = arith.constant 0 : index
    %3 = vector.load %arg7[%c0, %c0_1] : memref<8x32xf32, #tpu.memory_space<vmem>>, vector<8x32xf32>
    %c0_2 = arith.constant 0 : index
    %c0_3 = arith.constant 0 : index
    %4 = vector.load %arg3[%c0_2, %c0_3] : memref<8x24xbf16, #tpu.memory_space<vmem>>, vector<8x24xbf16>
    %c0_4 = arith.constant 0 : index
    %c0_5 = arith.constant 0 : index
    %5 = vector.load %arg4[%c0_4, %c0_5] : memref<24x32xbf16, #tpu.memory_space<vmem>>, vector<24x32xbf16>
    %cst = arith.constant dense<0.000000e+00> : vector<8x32xf32>
    %6 = tpu.matmul %4, %5, %cst {dimension_numbers = #tpu.dot_dimension_numbers<[1], [0], [0], [1], [0, 0, 1, 1], [], []>} : vector<8x24xbf16>, vector<24x32xbf16>, vector<8x32xf32> -> vector<8x32xf32>
    %7 = arith.addf %3, %6 : vector<8x32xf32>
    %c0_6 = arith.constant 0 : index
    %c0_7 = arith.constant 0 : index
    %8 = vector.load %arg7[%c0_6, %c0_7] : memref<8x32xf32, #tpu.memory_space<vmem>>, vector<8x32xf32>
    tpu.vector_store %arg7[%c0_6, %c0_7], %7 {strides = array<i32>} : memref<8x32xf32, #tpu.memory_space<vmem>>, vector<8x32xf32>,
    %c0_i32_8 = arith.constant 0 : i32
    %9 = arith.cmpi eq, %arg2, %c0_i32_8 : i32
    %10 = arith.extui %9 : i1 to i32
    %c0_i32_9 = arith.constant 0 : i32
    %11 = arith.cmpi ne, %10, %c0_i32_9 : i32
    scf.if %11 {
      %c0_10 = arith.constant 0 : index
      %c0_11 = arith.constant 0 : index
      %12 = vector.load %arg7[%c0_10, %c0_11] : memref<8x32xf32, #tpu.memory_space<vmem>>, vector<8x32xf32>
      %c0_12 = arith.constant 0 : index
      %c0_13 = arith.constant 0 : index
      %13 = vector.load %arg5[%c0_12, %c0_13] : memref<1x32xf32, #tpu.memory_space<vmem>>, vector<1x32xf32>
      %14 = vector.broadcast %13 : vector<1x32xf32> to vector<8x32xf32>
      %15 = arith.addf %12, %14 : vector<8x32xf32>
      %c0_14 = arith.constant 0 : index
      %c0_15 = arith.constant 0 : index
      %16 = vector.load %arg6[%c0_14, %c0_15] : memref<8x32xf32, #tpu.memory_space<vmem>>, vector<8x32xf32>
      tpu.vector_store %arg6[%c0_14, %c0_15], %15 {strides = array<i32>} : memref<8x32xf32, #tpu.memory_space<vmem>>, vector<8x32xf32>,
    } else {
    }
    return
  }
  func.func @transform_0(%arg0: i32, %arg1: i32, %arg2: i32) -> (i32, i32) {
    %c0_i32 = arith.constant 0 : i32
    return %arg0, %arg2 : i32, i32
  }
  func.func @transform_1(%arg0: i32, %arg1: i32, %arg2: i32) -> (i32, i32) {
    %c0_i32 = arith.constant 0 : i32
    return %arg2, %arg1 : i32, i32
  }
  func.func @transform_2(%arg0: i32, %arg1: i32, %arg2: i32) -> (i32, i32) {
    %c0_i32 = arith.constant 0 : i32
    %c0_i32_0 = arith.constant 0 : i32
    return %c0_i32, %arg1 : i32, i32
  }
  func.func @transform_3(%arg0: i32, %arg1: i32, %arg2: i32) -> (i32, i32) {
    %c0_i32 = arith.constant 0 : i32
    return %arg0, %arg1 : i32, i32
  }
}

</mosaic_0001>

<bundles_post_ra>
// kernel: tpu_custom_call.1
= control target key start
LH: loop header
LB: loop body
LE: loop exit
PB: predicated region body
PF: predicated region fallthrough
CT: control target
= control target key end

     0   :  { %8 = vsyncpa [#allocation4], 0  ;;  %s909_s0 = inlined_call_operand.hbm [shape: bf16[24,24], index: 0, kind: input, shape index: {}]   ;;  %s910_s1 = inlined_call_operand.hbm [shape: bf16[24,32], index: 1, kind: input, shape index: {}]   ;;  %s911_s2 = inlined_call_operand.vmem [shape: f32[1,32], index: 2, kind: input, shape index: {}]   ;;  %s912_s3 = inlined_call_operand.hbm [shape: f32[24,32], index: 3, kind: output, shape index: {}]  }
   0x1   :  { %10 = vsyncpa [#allocation4 + $0x1], 0 }
   0x2   :  { %11 = vsyncpa [#allocation7], 0 }
   0x3   :  { %12 = vsyncpa [#allocation5], 0 }
   0x4   :  { %14 = vsyncpa [#allocation5 + $0x1], 0  ;;  %s737_s12 = smov 0   ;;  %s739_s13 = smov 0  }
   0x5   :  { %s741_s14 = smov 0   ;;  %s743_s15 = smov 0  }
   0x6   :  { %s745_s16 = smov 0   ;;  %s747_s17 = smov 0  }
   0x7 LB: > { %s460_s18 = sadd.s32 4294967295, %s708_s17   ;;  %s461_s19 = sadd.s32 4294967294, %s708_s17   ;;  %s708_s17 = sphi %s747_s17, %s20_s17   ;;  %s704_s16 = sphi %s745_s16, %s929_s16   ;;  %s700_s15 = sphi %s743_s15, %s928_s15   ;;  %s696_s14 = sphi %s741_s14, %s927_s14   ;;  %s692_s13 = sphi %s739_s13, %s926_s13   ;;  %s688_s12 = sphi %s737_s12, %s925_s12  }
   0x8   : > { %p61_p0 = scmp.ne.s32.totalorder %s692_s13, %s688_s12  ;;  %p771_p1 = scmp.eq.s32.totalorder %s460_s18, 0 }
   0x9   : > { %p775_p2 = scmp.eq.s32.totalorder %s460_s18, 2  ;;  %p147_p3 = scmp.eq.s32.totalorder %s461_s19, 2 }
   0xa   : > { %p781_p4 = por %p771_p1, %p61_p0  ;;  %p462_p5 = scmp.ge.s32.totalorder %s708_s17, 1 }
   0xb   : > { %p786_p6 = por %p147_p3, %p61_p0  ;;  %p154_p7 = scmp.lt.s32.totalorder %s708_s17, 4 }
   0xc   : > { %s710_s25 = smov [#allocation6]   ;;  %s39_s28 = sadd.s32 1, %s704_s16 }
   0xd   : > { %s917_s23 = scalar_select %p786_p6, 1, 0 }
   0xe   : > { %p791_p8 = pnand %p462_p5, %p154_p7  ;;  %s170_s26 = sshll.u32 %s710_s25, 4  ;;  %s171_s26 = int_to_ptr.vmem [resolvable:$true] %s170_s26 }
   0xf   : > { %s581_s29 = scalar_lea.vmem %s171_s26, 192  ;;  %p589_p3 = scmp.lt.s32.totalorder %s171_s26, %s171_s26 }
  0x10   : > { %p499_p9 = pneg %p791_p8  ;;  %p582_p12 = scmp.ne.s32.totalorder %s171_s26, %s581_s29 }
  0x11   : > { %p590_p5 = scmp.lt.s32.totalorder %s581_s29, %s581_s29 }
  0x12   : > { %p799_p10 = pnand %p499_p9, %p771_p1 }
  0x13   : > { %p591_p7 = por %p590_p5, %p589_p3 }
  0x14   : > { %p572_p11 = pneg %p799_p10 }
  0x16   : > { %p584_p13 = pnand %p582_p12, %p572_p11 }
  0x18   : > { %p585_p0 = pneg %p584_p13 }
  0x1a   : > { %p592_p6 = pnand %p591_p7, %p585_p0 }
  0x1c   : > { %595 = shalt.err (!%p592_p6)
}
  0x1d   : > { %s711_s30 = smov 64   ;;  %s712_s4 = smov 4  }
  0x1e   : > { %502 = dma.hbm_to_vmem [thread:$0]  (!%p799_p10), %s910_s1, 192, %s171_s26, [#allocation7], %s711_s30, %s711_s30, %s712_s4  }
  0x1f   : > { %p41_p9 = scmp.ge.s32.totalorder %s39_s28, 3  ;;  %s48_s7 = sadd.s32 1, %s696_s14 }
  0x20   : > { %p55_p6 = scmp.ne.s32.totalorder %s696_s14, %s692_s13  ;;  %p56_p11 = scmp.eq.s32.totalorder %s708_s17, 0 }
  0x21   : > { %s931_s28 = smov (%p41_p9, %s39_s28), 0  ;;  %p512_p0 = scmp.lt.s32.totalorder %s708_s17, 3 }
  0x22   : > { %p817_p12 = por %p56_p11, %p55_p6  ;;  %p823_p13 = por %p775_p2, %p55_p6 }
  0x23   : > { %s43_s10 = ssub.s32 %s704_s16, %s931_s28  ;;  %s190_s11 = sand.u32 1, %s696_s14  }
  0x24   : > { %s921_s9 = scalar_select %p823_p13, 1, 0 }
  0x25   : > { %p46_p10 = scmp.eq.s32.totalorder %s43_s10, 0  ;;  %s466_s18 = sshll.u32 %s190_s11, 2 }
  0x26   : > { %s467_s25 = sshll.u32 %s704_s16, 6  ;;  %s194_s30 = scalar_lea.vmem [#allocation3], %s466_s18 }
  0x27   : > { %s832_s19 = scalar_select %p46_p10, %s696_s14, %s48_s7  }
  0x28   : > { %s200_s29 = scalar_lea.hbm %s909_s0, %s467_s25  ;;  %s202_s4 = sshll.u32 %s194_s30, 4  ;;  %s203_s4 = int_to_ptr.vmem [resolvable:$true] %s202_s4 }
  0x29   : > { %p840_p2 = pnand %p512_p0, %p817_p12  ;;  %s191_s5 = scalar_lea.sflag [#allocation4], %s190_s11 }
  0x2a   : > { %s609_s6 = scalar_lea.vmem %s203_s4, 64  ;;  %s713_s7 = smov [#allocation3]  }
  0x2b   : > { %p598_p3 = pneg %p840_p2  ;;  %p610_p5 = scmp.ne.s32.totalorder %s203_s4, %s609_s6 }
  0x2c   : > { %s614_s10 = sshll.u32 %s713_s7, 4  ;;  %s615_s10 = int_to_ptr.vmem [resolvable:$false] %s614_s10 }
  0x2d   : > { %p612_p7 = pnand %p610_p5, %p598_p3  ;;  %s616_s25 = scalar_lea.vmem %s615_s10, 128 }
  0x2e   : > { %p617_p6 = scmp.lt.s32.totalorder %s203_s4, %s615_s10  ;;  %p618_p11 = scmp.lt.s32.totalorder %s616_s25, %s609_s6 }
  0x2f   : > { %p613_p9 = pneg %p612_p7 }
  0x30   : > { %p619_p10 = por %p618_p11, %p617_p6 }
  0x32   : > { %p620_p13 = pnand %p619_p10, %p613_p9 }
  0x34   : > { %623 = shalt.err (!%p620_p13)
}
  0x35   : > { %506 = dma.hbm_to_vmem [thread:$0]  (!%p840_p2), %s200_s29, 64, %s203_s4, %s191_s5  }
  0x36   : > { %211 = sbr.rel (%p791_p8) target bundleno = 290 (0x122), region = 32  ;;  %s851_s8 = sand.u32 (!%p791_p8), 1, %s692_s13  }
  0x37   : > { %s469_s11 = sshll.u32 (!%p791_p8), %s851_s8, 2  ;;  %s214_s18 = scalar_lea.sflag (!%p791_p8), [#allocation4], %s851_s8 }
  0x38   : > { %s217_s26 = scalar_lea.vmem (!%p791_p8), [#allocation3], %s469_s11 }
  0x3b   : > { %675 = dma.done.wait (%p781_p4), %s214_s18, 64  }
  0x3c   : > { %677 = vsyncadd (%p781_p4), %s214_s18, 4294967232 }
  0x3d   : > { %679 = dma.done.wait (%p771_p1), [#allocation7], 192  }
  0x3e   : > { %681 = vsyncadd (%p771_p1), [#allocation7], 4294967104  ;;  %vm256_vm0 = vcmask 261120   ;;  %v714_v0 = vmov 0.0   ;;  %vm715_vm1 = vmmov 0   ;;  %vm276_vm2 = vcmask 1043456  }
  0x3f   : > { %257 = vst.msk [vmem:[#allocation2] sm:$0xff] %vm256_vm0, %v714_v0  ;;  %483 = vmatprep.subr.bf16.mxu0 %v714_v0  ;;  %487 = vmatprep.mubr.msk.bf16.mxu0 %vm715_vm1, %v714_v0  ;;  %v568_v1 = vld [vmem:[#allocation6 + $0x8] ss:$0 sps:$4 sm:$0xff]   ;;  %v569_v3 = vld [vmem:[#allocation6] sm:$0xff]   ;;  %v259_v4 = vld [vmem:[%s217_s26] sm:$0xf] }
  0x40   : > { %v278_v2 = vsel %vm276_vm2, %v568_v1, 0  ;;  %vm272_vm3 = vcmask 195584   ;;  %s471_s20 = sshll.u32 %s851_s8, 3  ;;  %v475_v11 = vld [vmem:[%s911_s2] ss:$0 sm:$0xff]  ;;  %s477_s27 = sshll.u32 %s700_s15, 7 }
  0x41   : > { %484 = vmatpush3.bf16.msra.mxu0 %v278_v2  ;;  %s246_s29 = scalar_lea.vmem [#allocation8], %s471_s20  ;;  %s349_s5 = scalar_lea.hbm %s912_s3, %s477_s27 }
  0x42   : > { %485 = vmatprep.subr.bf16.mxu0 %v714_v0  ;;  %s351_s30 = sshll.u32 %s246_s29, 4  ;;  %s337_s6 = scalar_lea.sflag [#allocation5], %s851_s8  ;;  %s352_s30 = int_to_ptr.vmem [resolvable:$true] %s351_s30 }
  0x43   : > { %s624_s7 = scalar_lea.vmem %s352_s30, 128  ;;  %p923_p4 = scmp.ne.s32.totalorder %s921_s9, 0 }
  0x44   : > { %p625_p1 = scmp.ne.s32.totalorder %s352_s30, %s624_s7  ;;  %s716_s10 = smov [#allocation8]  }
  0x45   : > { %486 = vmatpush3.bf16.msra.mxu0 %v569_v3  ;;  %s628_s25 = sshll.u32 %s716_s10, 4  ;;  %s629_s25 = int_to_ptr.vmem [resolvable:$false] %s628_s25 }
  0x46   : > { %v258_v5 = vld [vmem:[#allocation2] sm:$0xff]  ;;  %p626_p8 = pnand %p625_p1, %p923_p4  ;;  %s630_s15 = scalar_lea.vmem %s629_s25, 256 }
  0x47   : > { %p631_p13 = scmp.lt.s32.totalorder %s352_s30, %s629_s25  ;;  %p632_p0 = scmp.lt.s32.totalorder %s630_s15, %s624_s7 }
  0x48   : > { %488 = vmatmul.mubr.msk.bf16.vlgmr.msra.gmra.mxu0 %vm272_vm3, %v259_v4  ;;  %p627_p12 = pneg %p626_p8 }
  0x49   : > { %p633_p2 = por %p632_p0, %p631_p13 }
  0x4b   : > { %p634_p3 = pnand %p633_p2, %p627_p12 }
 0x108   : > { %v314_v6 = vpop.f32.mrf.mxu0 }
 0x109   : > { %v320_v7 = vadd.f32 %v314_v6, %v258_v5 }
 0x10a   : > { %v489_v8 = vpop.f32.mrf.mxu0 }
 0x10b   : > { %322 = vst.msk [vmem:[#allocation2] sm:$0xff] %vm256_vm0, %v320_v7 }
 0x10c   : > { %v317_v9 = vpop.f32.mrf.mxu0 }
 0x10e   : > { %v490_v10 = vpop.f32.mrf.mxu0 }
 0x112   : > { %v326_v12 = vld [vmem:[#allocation2] sm:$0xff] }
 0x113   : > { %v334_v13 = vadd.f32 %v475_v11, %v326_v12 }
 0x115   : > { %335 = vst.msk [vmem:[%s246_s29] sm:$0xff] %vm256_vm0, %v334_v13 }
 0x116   : > { %637 = shalt.err (!%p634_p3)
}
 0x117   : > { %s638_s11 = scalar_lea.hbm %s349_s5, 128  ;;  %s642_s26 = scalar_lea.hbm %s912_s3, 384 }
 0x118   : > { %p639_p5 = scmp.ne.s32.totalorder %s349_s5, %s638_s11  ;;  %p643_p6 = scmp.lt.s32.totalorder %s349_s5, %s912_s3 }
 0x119   : > { %p644_p11 = scmp.lt.s32.totalorder %s642_s26, %s638_s11 }
 0x11a   : > { %p640_p7 = pnand %p639_p5, %p923_p4 }
 0x11b   : > { %p645_p10 = por %p644_p11, %p643_p6 }
 0x11c   : > { %p641_p9 = pneg %p640_p7 }
 0x11e   : > { %p646_p1 = pnand %p645_p10, %p641_p9 }
 0x120   : > { %649 = shalt.err (!%p646_p1)
}
 0x121   : > { %497 = dma.vmem_to_hbm [thread:$0]  (%p923_p4), %s352_s30, 128, %s349_s5, %s337_s6  }
 0x122 PF: > { %p514_p8 = scmp.ge.s32.totalorder %s708_s17, 2  ;;  %s363_s24 = sand.u32 1, %s688_s12  }
 0x123   : > { %p924_p12 = scmp.ne.s32.totalorder %s917_s23, 0  ;;  %s364_s27 = scalar_lea.sflag [#allocation5], %s363_s24 }
 0x125   : > { %p508_p13 = pnand %p514_p8, %p924_p12 }
 0x127   : > { %p509_p0 = pneg %p508_p13 }
 0x129   : > { %683 = dma.done.wait (%p509_p0), %s364_s27, 128  }
 0x12a   : > { %685 = vsyncadd (%p509_p0), %s364_s27, 4294967168  ;;  %s20_s17 = sadd.s32 1, %s708_s17   ;;  %s925_s12 = smov %s692_s13 }
 0x12b   : > { %p17_p2 = scmp.ge.s32.totalorder %s20_s17, 5   ;;  %s926_s13 = smov %s696_s14 }
 0x12c   : > { %s927_s14 = smov %s832_s19  ;;  %s928_s15 = smov %s704_s16 }
 0x12d   : > { %s929_s16 = smov %s931_s28  ;;  %19 = sbr.rel (!%p17_p2) target bundleno = 7 (0x7), region = 93 }
 0x132   :  { %369 = vsyncpa [#allocation4], 1 }
 0x133   :  { %371 = vsyncpa [#allocation4 + $0x1], 1 }
 0x134   :  { %372 = vsyncpa [#allocation7], 1 }
 0x135   :  { %373 = vsyncpa [#allocation5], 1 }
 0x136   :  { %375 = vsyncpa [#allocation5 + $0x1], 1 }

</bundles_post_ra>
